<compile_context>
chip_gen: v7x
topology: tpu7x:2x2x1
jax: 0.10.0
libtpu: 0.0.40
codegen_flags: <defaults>
</compile_context>

<pallas_src>
import math

import jax
import jax.numpy as jnp
from jax.experimental import pallas as pl
from jax.experimental.pallas import tpu as pltpu


def diffusion_embedding_kernel(steps_ref, table_ref, w2_ref, b2_ref, o_ref):
    # steps_ref: (B, 1) int32
    # table_ref: (T_pad, D_proj) f32   -- already silu(embedding @ W1 + b1), zero-padded rows
    # w2_ref:    (D_proj, D_proj) f32  -- pre-transposed to (in, out)
    # b2_ref:    (1, D_proj) f32
    # o_ref:     (B, D_proj) f32
    B = o_ref.shape[0]
    T = table_ref.shape[0]

    # Exact in-kernel row gather: one-hot selector matmul on the MXU.
    t_ids = jax.lax.broadcasted_iota(jnp.int32, (B, T), 1)            # lane iota
    one_hot = (t_ids == steps_ref[...]).astype(jnp.float32)           # (B, T_pad)
    h = jnp.dot(one_hot, table_ref[...],
                preferred_element_type=jnp.float32)                   # (B, D_proj) == silu(emb@W1+b1)[steps]

    # projection2 + SiLU, all f32 (bias add + sigmoid + mul stay on VPU/EUP in f32,
    # which is the native path on v5e and fine everywhere else).
    y = jnp.dot(h, w2_ref[...], preferred_element_type=jnp.float32) + b2_ref[...]
    y = y * jax.nn.sigmoid(y)

    o_ref[...] = y.astype(o_ref.dtype)


def build_embedding(num_steps, dim):
    # Mirrors DiffusionEmbedding._build_embedding (dim = embedding_dim / 2).
    steps = jnp.arange(num_steps, dtype=jnp.float32)[:, None]                           # (T, 1)
    freqs = (10.0 ** (jnp.arange(dim, dtype=jnp.float32) / (dim - 1) * 4.0))[None, :]   # (1, dim)
    table = steps * freqs                                                               # (T, dim)
    return jnp.concatenate([jnp.sin(table), jnp.cos(table)], axis=1)                    # (T, 2*dim)


def fold_projection1(embedding, w1, b1):
    """Precompute silu(embedding @ W1 + b1) once at setup, zero-padded to a
    sublane-aligned number of rows.  Exact: row-gather commutes with this map."""
    folded = embedding @ w1 + b1                       # (T, D_proj) f32
    folded = folded * jax.nn.sigmoid(folded)
    T = folded.shape[0]
    T_pad = int(math.ceil(T / 8) * 8)
    if T_pad != T:
        folded = jnp.pad(folded, ((0, T_pad - T), (0, 0)))
    return folded


def diffusion_embedding_forward(diffusion_step, folded_table, w2, b2):
    B = diffusion_step.shape[0]
    T_pad, d_proj = folded_table.shape

    # NOTE: the reference module only supports integer step indexing; fractional
    # steps (fast-sampling lerp variants) are out of scope here.
    steps_2d = diffusion_step.astype(jnp.int32).reshape(B, 1)
    b2_2d = b2.reshape(1, d_proj).astype(jnp.float32)

    vmem = pltpu.MemorySpace.VMEM
    cost = pl.CostEstimate(
        flops=2 * B * (T_pad * d_proj + d_proj * d_proj),
        transcendentals=B * d_proj,
        bytes_accessed=(4 * B                      # step indices
                        + 4 * T_pad * d_proj       # folded table (f32)
                        + 4 * d_proj * d_proj      # w2 (f32)
                        + 4 * d_proj               # b2
                        + 4 * B * d_proj),         # output
    )

    return pl.pallas_call(
        diffusion_embedding_kernel,
        out_shape=jax.ShapeDtypeStruct((B, d_proj), jnp.float32),
        in_specs=[
            pl.BlockSpec(memory_space=vmem),   # diffusion steps (B, 1) int32
            pl.BlockSpec(memory_space=vmem),   # folded table (T_pad, D_proj) f32
            pl.BlockSpec(memory_space=vmem),   # w2 (D_proj, D_proj) f32
            pl.BlockSpec(memory_space=vmem),   # b2 (1, D_proj) f32
        ],
        out_specs=pl.BlockSpec(memory_space=vmem),
        cost_estimate=cost,
    )(steps_2d, folded_table, w2, b2_2d)


def _torch_linear_init(key, in_dim, out_dim):
    # torch.nn.Linear default init: U(-1/sqrt(in), 1/sqrt(in)) for W and b.
    kw, kb = jax.random.split(key)
    bound = 1.0 / math.sqrt(in_dim)
    w = jax.random.uniform(kw, (out_dim, in_dim), jnp.float32, -bound, bound)
    b = jax.random.uniform(kb, (out_dim,), jnp.float32, -bound, bound)
    return w, b


if __name__ == "__main__":
    num_steps = 50
    embedding_dim = 128
    projection_dim = 128
    batch = 8

    key = jax.random.PRNGKey(0)
    k1, k2, k3 = jax.random.split(key, 3)

    # Parameters (deterministic, torch-Linear-like init), f32 throughout.
    w1_t, b1 = _torch_linear_init(k1, embedding_dim, projection_dim)   # (out, in)
    w2_t, b2 = _torch_linear_init(k2, projection_dim, projection_dim)  # (out, in)
    w1 = jnp.transpose(w1_t)                  # (D_emb,  D_proj)
    w2 = jnp.transpose(w2_t)                  # (D_proj, D_proj)

    embedding = build_embedding(num_steps, embedding_dim // 2)          # (50, 128) f32
    diffusion_step = jax.random.randint(k3, (batch,), 0, num_steps)     # (B,) int32

    # One-time setup: fold projection1 + SiLU into the table (exact), pad rows to 64.
    folded_table = fold_projection1(embedding, w1, b1)                  # (64, 128) f32

    out = diffusion_embedding_forward(diffusion_step, folded_table, w2, b2)
    out = jax.block_until_ready(out)

    # Pure-JAX f32 reference of the PyTorch forward.
    x_ref = embedding[diffusion_step]
    h_ref = x_ref @ w1 + b1
    h_ref = h_ref * jax.nn.sigmoid(h_ref)
    y_ref = h_ref @ w2 + b2
    y_ref = y_ref * jax.nn.sigmoid(y_ref)

    assert out.shape == (batch, projection_dim)
    err = float(jnp.max(jnp.abs(out - y_ref)))
    assert err < 1e-4, f"max abs err {err}"
    print("KERNEL_OK")
</pallas_src>

<mosaic_0001>
module attributes {stable_mosaic.version = 11 : i64} {
  func.func @diffusion_embedding_kernel(%arg0: memref<8x1xi32, #tpu.memory_space<vmem>>, %arg1: memref<56x128xf32, #tpu.memory_space<vmem>>, %arg2: memref<128x128xf32, #tpu.memory_space<vmem>>, %arg3: memref<1x128xf32, #tpu.memory_space<vmem>>, %arg4: memref<8x128xf32, #tpu.memory_space<vmem>>) attributes {dimension_semantics = [], scalar_prefetch = 0 : i64, scratch_operands = 0 : i64, tpu.core_type = #tpu.core_type<tc>} {
    %0 = tpu.iota {dimensions = array<i32: 1>} : vector<8x56xi32>
    %c0 = arith.constant 0 : index
    %c0_0 = arith.constant 0 : index
    %1 = vector.load %arg0[%c0, %c0_0] : memref<8x1xi32, #tpu.memory_space<vmem>>, vector<8x1xi32>
    %2 = vector.broadcast %1 : vector<8x1xi32> to vector<8x56xi32>
    %3 = arith.cmpi eq, %0, %2 : vector<8x56xi32>
    %4 = arith.extui %3 : vector<8x56xi1> to vector<8x56xi32>
    %5 = arith.sitofp %4 : vector<8x56xi32> to vector<8x56xf32>
    %c0_1 = arith.constant 0 : index
    %c0_2 = arith.constant 0 : index
    %6 = vector.load %arg1[%c0_1, %c0_2] : memref<56x128xf32, #tpu.memory_space<vmem>>, vector<56x128xf32>
    %cst = arith.constant dense<0.000000e+00> : vector<8x128xf32>
    %7 = tpu.matmul %5, %6, %cst {dimension_numbers = #tpu.dot_dimension_numbers<[1], [0], [0], [1], [0, 0, 1, 1], [], []>} : vector<8x56xf32>, vector<56x128xf32>, vector<8x128xf32> -> vector<8x128xf32>
    %c0_3 = arith.constant 0 : index
    %c0_4 = arith.constant 0 : index
    %8 = vector.load %arg2[%c0_3, %c0_4] : memref<128x128xf32, #tpu.memory_space<vmem>>, vector<128x128xf32>
    %cst_5 = arith.constant dense<0.000000e+00> : vector<8x128xf32>
    %9 = tpu.matmul %7, %8, %cst_5 {dimension_numbers = #tpu.dot_dimension_numbers<[1], [0], [0], [1], [0, 0, 1, 1], [], []>} : vector<8x128xf32>, vector<128x128xf32>, vector<8x128xf32> -> vector<8x128xf32>
    %c0_6 = arith.constant 0 : index
    %c0_7 = arith.constant 0 : index
    %10 = vector.load %arg3[%c0_6, %c0_7] : memref<1x128xf32, #tpu.memory_space<vmem>>, vector<1x128xf32>
    %11 = vector.broadcast %10 : vector<1x128xf32> to vector<8x128xf32>
    %12 = arith.addf %9, %11 : vector<8x128xf32>
    %13 = arith.negf %12 : vector<8x128xf32>
    %14 = math.exp %13 : vector<8x128xf32>
    %cst_8 = arith.constant 1.000000e+00 : f32
    %15 = vector.broadcast %cst_8 : f32 to vector<8x128xf32>
    %16 = arith.addf %15, %14 : vector<8x128xf32>
    %17 = arith.divf %15, %16 : vector<8x128xf32>
    %18 = arith.mulf %12, %17 : vector<8x128xf32>
    %c0_9 = arith.constant 0 : index
    %c0_10 = arith.constant 0 : index
    %19 = vector.load %arg4[%c0_9, %c0_10] : memref<8x128xf32, #tpu.memory_space<vmem>>, vector<8x128xf32>
    tpu.vector_store %arg4[%c0_9, %c0_10], %18 {strides = array<i32>} : memref<8x128xf32, #tpu.memory_space<vmem>>, vector<8x128xf32>,
    return
  }
}

</mosaic_0001>

<bundles_post_ra>
// kernel: tpu_custom_call.1
= control target key start
LH: loop header
LB: loop body
LE: loop exit
PB: predicated region body
PF: predicated region fallthrough
CT: control target
= control target key end

     0   :  { %9 = vsyncpa [#allocation3], 0  ;;  %s540_s0 = inlined_call_operand.vmem [shape: s32[8,1], index: 0, kind: input, shape index: {}]   ;;  %s541_s1 = inlined_call_operand.hbm [shape: f32[56,128], index: 1, kind: input, shape index: {}]   ;;  %s542_s2 = inlined_call_operand.hbm [shape: f32[128,128], index: 2, kind: input, shape index: {}]   ;;  %s543_s3 = inlined_call_operand.vmem [shape: f32[1,128], index: 3, kind: input, shape index: {}]   ;;  %s544_s4 = inlined_call_operand.hbm [shape: f32[8,128], index: 4, kind: output, shape index: {}]  }
   0x1   :  { %10 = vsyncpa [#allocation6], 0 }
   0x2   :  { %11 = vsyncpa [#allocation4], 0  ;;  %s453_s15 = smov [#allocation2]   ;;  %s381_s19 = scalar_lea.hbm %s541_s1, 896 }
   0x3   :  { %s19_s16 = sshll.u32 %s453_s15, 4  ;;  %p382_p0 = scmp.ne.s32.totalorder %s541_s1, %s381_s19  ;;  %s20_s16 = int_to_ptr.vmem [resolvable:$true] %s19_s16 }
   0x4   :  { %p385_p1 = scmp.lt.u32.totalorder %s381_s19, %s541_s1 }
   0x6   :  { %p387_p2 = pnand %p385_p1, %p382_p0 }
   0x8   :  { %390 = shalt.err (!%p387_p2)
}
   0x9   :  { %s391_s24 = scalar_lea.vmem %s20_s16, 896  ;;  %p396_p4 = scmp.lt.s32.totalorder %s20_s16, %s20_s16 }
   0xa   :  { %p392_p3 = scmp.ne.s32.totalorder %s20_s16, %s391_s24  ;;  %p397_p5 = scmp.lt.s32.totalorder %s391_s24, %s391_s24 }
   0xc   :  { %p398_p6 = por %p397_p5, %p396_p4 }
   0xe   :  { %p399_p7 = pnand %p398_p6, %p392_p3 }
  0x10   :  { %402 = shalt.err (!%p399_p7)
}
  0x11   :  { %s454_s25 = smov 128   ;;  %s455_s26 = smov 8  }
  0x12   :  { %25 = dma.hbm_to_vmem [thread:$0]  %s541_s1, 896, %s20_s16, [#allocation3], %s454_s25, %s454_s25, %s455_s26  }
  0x13   :  { %s456_s29 = smov [#allocation5]   ;;  %s403_s7 = scalar_lea.hbm %s542_s2, 2048 }
  0x14   :  { %s31_s30 = sshll.u32 %s456_s29, 4  ;;  %p404_p8 = scmp.ne.s32.totalorder %s542_s2, %s403_s7  ;;  %s32_s30 = int_to_ptr.vmem [resolvable:$true] %s31_s30 }
  0x15   :  { %p407_p9 = scmp.lt.u32.totalorder %s403_s7, %s542_s2 }
  0x17   :  { %p409_p10 = pnand %p407_p9, %p404_p8 }
  0x19   :  { %412 = shalt.err (!%p409_p10)
}
  0x1a   :  { %s413_s12 = scalar_lea.vmem %s32_s30, 2048  ;;  %p418_p12 = scmp.lt.s32.totalorder %s32_s30, %s32_s30 }
  0x1b   :  { %p414_p11 = scmp.ne.s32.totalorder %s32_s30, %s413_s12  ;;  %p419_p13 = scmp.lt.s32.totalorder %s413_s12, %s413_s12 }
  0x1d   :  { %p420_p0 = por %p419_p13, %p418_p12 }
  0x1f   :  { %p421_p1 = pnand %p420_p0, %p414_p11 }
  0x21   :  { %424 = shalt.err (!%p421_p1)
}
  0x22   :  { %37 = dma.hbm_to_vmem [thread:$0]  %s542_s2, 2048, %s32_s30, [#allocation6], %s454_s25, %s454_s25, %s455_s26  }
  0x23   :  { %447 = dma.done.wait [#allocation3], 896  }
  0x24   :  { %448 = vsyncadd [#allocation3], 4294966400 }
  0x25   :  { %449 = dma.done.wait [#allocation6], 2048  }
  0x26   :  { %450 = vsyncadd [#allocation6], 4294965248  ;;  %v457_v0 = vmov 0   ;;  %v458_v1 = vmov 0.0|0.0   ;;  %v48_v2 = vld [vmem:[%s540_s0] sm:$0xff]  ;;  %v55_v3 = vld [vmem:[#allocation2] sm:$0xff]  ;;  %v46_v38 = vlaneseq }
  0x27   :  { %376 = vset.pattern.permute.xlu0 %v457_v0  ;;  %334 = vmatprep.subr.bf16.mxu0 %v458_v1  ;;  %v56_v4 = vld [vmem:[#allocation2 + $0x8] sm:$0xff]  ;;  %v57_v6 = vld [vmem:[#allocation2 + $0x10] sm:$0xff]  ;;  %v58_v7 = vld [vmem:[#allocation2 + $0x18] sm:$0xff]  ;;  %vm459_vm0 = vmmov 0   ;;  %v460_v8 = vmov 0.0   ;;  %vm62_vm1 = vcmask 457728  }
  0x28   :  { %343 = vmatprep.subr.bf16.mxu1 %v458_v1  ;;  %50 = vperm.xlu0 %376, %v48_v2   ;;  %v335_v5 = vpack.c.bf16 %v56_v4, %v55_v3  ;;  %v338_v9 = vpack.c.bf16 %v58_v7, %v57_v6  ;;  %v136_v10 = vld [vmem:[#allocation5] sm:$0xff]  ;;  %v137_v11 = vld [vmem:[#allocation5 + $0x8] sm:$0xff]  ;;  %v138_v12 = vld [vmem:[#allocation5 + $0x10] sm:$0xff]  ;;  %v47_v39 = vand.u32 127, %v46_v38  ;;  %s461_s16 = smov [#allocation7]  }
  0x29   :  { %296 = vmatprep.mubr.msk.f32.mxu0 %vm459_vm0, %v460_v8  ;;  %331 = vmatprep.mubr.msk.f32.mxu1 %vm459_vm0, %v460_v8  ;;  %v59_v13 = vld [vmem:[#allocation2 + $0x20] sm:$0xff]  ;;  %v60_v14 = vld [vmem:[#allocation2 + $0x28] sm:$0xff]  ;;  %v344_v15 = vpack.c.bf16 %v137_v11, %v136_v10  ;;  %v139_v16 = vld [vmem:[#allocation5 + $0x18] sm:$0xff]  ;;  %s243_s17 = sshll.u32 %s461_s16, 4  ;;  %s244_s17 = int_to_ptr.vmem [resolvable:$true] %s243_s17 }
  0x2a   :  { %336 = vmatpush3.bf16.msra.mxu0 %v335_v5  ;;  %v347_v17 = vpack.c.bf16 %v139_v16, %v138_v12  ;;  %v341_v18 = vpack.c.bf16 %v60_v14, %v59_v13  ;;  %v140_v19 = vld [vmem:[#allocation5 + $0x20] sm:$0xff]  ;;  %v141_v20 = vld [vmem:[#allocation5 + $0x28] sm:$0xff]  ;;  %v142_v22 = vld [vmem:[#allocation5 + $0x30] sm:$0xff]  ;;  %s425_s18 = scalar_lea.vmem %s244_s17, 128  ;;  %p430_p3 = scmp.lt.s32.totalorder %s244_s17, %s244_s17 }
  0x2b   :  { %337 = vmatprep.subr.bf16.mxu0 %v458_v1  ;;  %345 = vmatpush3.bf16.msra.mxu1 %v344_v15  ;;  %v350_v21 = vpack.c.bf16 %v141_v20, %v140_v19  ;;  %v143_v23 = vld [vmem:[#allocation5 + $0x38] sm:$0xff]  ;;  %v144_v26 = vld [vmem:[#allocation5 + $0x40] sm:$0xff]  ;;  %v145_v27 = vld [vmem:[#allocation5 + $0x48] sm:$0xff]  ;;  %p426_p2 = scmp.ne.s32.totalorder %s244_s17, %s425_s18  ;;  %p431_p4 = scmp.lt.s32.totalorder %s425_s18, %s425_s18 }
  0x2c   :  { %346 = vmatprep.subr.bf16.mxu1 %v458_v1  ;;  %v61_v24 = vld [vmem:[#allocation2 + $0x30] sm:$0xff]  ;;  %v353_v25 = vpack.c.bf16 %v143_v23, %v142_v22  ;;  %v356_v28 = vpack.c.bf16 %v145_v27, %v144_v26  ;;  %v146_v29 = vld [vmem:[#allocation5 + $0x50] sm:$0xff]  ;;  %v148_v32 = vld [vmem:[#allocation5 + $0x60] sm:$0xff] }
  0x2d   :  { %v147_v30 = vld [vmem:[#allocation5 + $0x58] sm:$0xff]  ;;  %v149_v33 = vld [vmem:[#allocation5 + $0x68] sm:$0xff]  ;;  %v150_v35 = vld [vmem:[#allocation5 + $0x70] sm:$0xff]  ;;  %p432_p5 = por %p431_p4, %p430_p3 }
  0x2e   :  { %339 = vmatpush3.bf16.msra.mxu0 %v338_v9  ;;  %v359_v31 = vpack.c.bf16 %v147_v30, %v146_v29  ;;  %v362_v34 = vpack.c.bf16 %v149_v33, %v148_v32  ;;  %v151_v36 = vld [vmem:[#allocation5 + $0x78] sm:$0xff] }
  0x2f   :  { %340 = vmatprep.subr.bf16.mxu0 %v458_v1  ;;  %348 = vmatpush3.bf16.msra.mxu1 %v347_v17  ;;  %v365_v37 = vpack.c.bf16 %v151_v36, %v150_v35  ;;  %v255_v44 = vld [vmem:[%s543_s3] ss:$0 sm:$0xff]  ;;  %p433_p6 = pnand %p432_p5, %p426_p2 }
  0x30   :  { %349 = vmatprep.subr.bf16.mxu1 %v458_v1 }
  0x32   :  { %342 = vmatpush3.bf16.msra.mxu0 %v341_v18 }
  0x33   :  { %294 = vmatprep.subr.mxu0 %v460_v8  ;;  %351 = vmatpush3.bf16.msra.mxu1 %v350_v21 }
  0x34   :  { %352 = vmatprep.subr.bf16.mxu1 %v458_v1 }
  0x36   :  { %295 = vmatpush3.msra.mxu0 %v61_v24 }
  0x37   :  { %354 = vmatpush3.bf16.msra.mxu1 %v353_v25 }
  0x38   :  { %355 = vmatprep.subr.bf16.mxu1 %v458_v1 }
  0x3b   :  { %357 = vmatpush3.bf16.msra.mxu1 %v356_v28 }
  0x3c   :  { %358 = vmatprep.subr.bf16.mxu1 %v458_v1 }
  0x3f   :  { %360 = vmatpush3.bf16.msra.mxu1 %v359_v31 }
  0x40   :  { %361 = vmatprep.subr.bf16.mxu1 %v458_v1 }
  0x43   :  { %363 = vmatpush3.bf16.msra.mxu1 %v362_v34 }
  0x44   :  { %364 = vmatprep.subr.bf16.mxu1 %v458_v1 }
  0x47   :  { %366 = vmatpush3.bf16.msra.mxu1 %v365_v37 }
  0xa7   :  { %v51_v40 = vpop.permute.xlu0 %50 }
  0xa8   :  { %vm52_vm2 = vcmp.eq.s32.totalorder %v47_v39, %v51_v40 }
  0xa9   :  { %v253_v41 = vsel %vm52_vm2, 1.0, %v460_v8 }
  0xaa   :  { %297 = vmatmul.mubr.msk.f32.vlgmr.msra.gmra.mrb[0].mxu0 %vm62_vm1, %v253_v41 }
 0x17d   :  { %v132_v42 = vpop.f32.mrb[0].mxu0 }
 0x17e   :  { %v298_v43 = vpop.f32.mrb[1].mxu0  ;;  %332 = vmatmul.mubr.f32.vlgmr.msra.gmra.mrb[0].mxu1 %v132_v42 }
 0x251   :  { %v225_v45 = vpop.f32.mrb[0].mxu1 }
 0x252   :  { %v226_v46 = vadd.f32 %v255_v44, %v225_v45  ;;  %v333_v47 = vpop.f32.mrb[1].mxu1 }
 0x254   :  { %v256_v48 = vmul.f32 -1.442695, %v226_v46 }
 0x256   :  { %377 = vpow2.f32 %v256_v48 }
 0x260   :  { %v378_v49 = vpop.eup %377 }
 0x261   :  { %v232_v50 = vadd.f32 1.0, %v378_v49 }
 0x263   :  { %379 = vrcp.f32 %v232_v50 }
 0x26d   :  { %v380_v51 = vpop.eup %379 }
 0x26e   :  { %v235_v52 = vmul.f32 %v380_v51, %v226_v46 }
 0x270   :  { %236 = vst [vmem:[#allocation7] sm:$0xff] %v235_v52 }
 0x271   :  { %436 = shalt.err (!%p433_p6)
}
 0x272   :  { %s437_s20 = scalar_lea.hbm %s544_s4, 128 }
 0x273   :  { %p438_p7 = scmp.ne.s32.totalorder %s544_s4, %s437_s20  ;;  %p441_p8 = scmp.lt.u32.totalorder %s437_s20, %s544_s4 }
 0x275   :  { %p443_p9 = pnand %p441_p8, %p438_p7 }
 0x277   :  { %446 = shalt.err (!%p443_p9)
}
 0x278   :  { %246 = dma.vmem_to_hbm [thread:$0]  %s244_s17, 128, %s544_s4, [#allocation4]  }
 0x279   :  { %451 = dma.done.wait [#allocation4], 128  }
 0x27a   :  { %452 = vsyncadd [#allocation4], 4294967168 }
 0x27b   :  { %250 = vsyncpa [#allocation3], 1 }
 0x27c   :  { %251 = vsyncpa [#allocation6], 1 }
 0x27d   :  { %252 = vsyncpa [#allocation4], 1 }

</bundles_post_ra>
